<compile_context>
chip_gen: v7x
topology: tpu7x:2x2x1
jax: 0.10.0
libtpu: 0.0.40
codegen_flags: <defaults>
</compile_context>

<pallas_src>
import functools

import jax
import jax.numpy as jnp
from jax import lax
from jax.experimental import pallas as pl
from jax.experimental.pallas import tpu as pltpu

LANES = 128
MAX_TILE_ROWS = 4096   # (4096, 128) f32 = 2 MiB per input block
NUM_PARTIALS = 2       # outer "parallel" axis (both TCs on v7x; no-op cost on 1-TC chips)


def _cdiv(a, b):
    return -(-a // b)


def _round_up(a, m):
    return _cdiv(a, m) * m


def _mask_pixel_loss_kernel(m_ref, a_ref, b_ref, out_ref, acc_ref, *,
                            rows, tile_rows, inner_steps):
    p = pl.program_id(0)
    i = pl.program_id(1)

    @pl.when(i == 0)
    def _():
        acc_ref[...] = jnp.zeros_like(acc_ref)

    # Logical tile index (the input index_map clamps the DMA for tiles that lie
    # entirely past the data; the mask below zeroes their contribution).
    blk = p * inner_steps + i
    limit = rows - blk * tile_rows  # valid rows in this tile (may be <= 0)
    row_ids = lax.broadcasted_iota(jnp.int32, (tile_rows, LANES), 0)
    valid = row_ids < limit

    d = (a_ref[...].astype(jnp.float32) - b_ref[...].astype(jnp.float32)) \
        * m_ref[...].astype(jnp.float32)
    dd = jnp.where(valid, d * d, jnp.float32(0.0))

    # Pure-VPU accumulation: fold the tile's sublane groups (leading dim of the
    # reshape) into the vreg-shaped accumulator. Cross-lane reduce happens once,
    # outside the kernel.
    acc_ref[...] += jnp.sum(dd.reshape(tile_rows // 8, 8, LANES), axis=0)

    @pl.when(i == inner_steps - 1)
    def _():
        out_ref[...] = acc_ref[...]


def mask_pixel_loss(mask_image, image1, image2):
    """JAX/Pallas equivalent of the PyTorch mask_pixel_loss module forward."""
    # weight = image1.shape[2] * image2.shape[3]  (H * W for NCHW inputs)
    weight = float(image1.shape[2] * image2.shape[3])

    total = mask_image.size
    rows = _cdiv(total, LANES)
    tile_rows = min(MAX_TILE_ROWS, _round_up(rows, 8))
    total_blocks = _cdiv(rows, tile_rows)
    inner_steps = _cdiv(total_blocks, NUM_PARTIALS)

    def as_rows(x):
        # Keep native dtype (cast happens in-kernel); reshape is free for
        # contiguous arrays. Only pad (tiny, lane tail) if numel % 128 != 0;
        # zeros are harmless for a sum of squares.
        flat = x.reshape(-1)
        pad = rows * LANES - total
        if pad:
            flat = jnp.pad(flat, (0, pad))
        return flat.reshape(rows, LANES)

    m = as_rows(mask_image)
    a = as_rows(image1)
    b = as_rows(image2)

    def in_map(p, i):
        blk = p * inner_steps + i
        # Clamp so tiles past the end of the data never DMA out of bounds;
        # the in-kernel row mask makes their contribution exactly zero.
        return (jnp.minimum(blk, total_blocks - 1), 0)

    tile_spec = pl.BlockSpec((tile_rows, LANES), in_map)

    partials = pl.pallas_call(
        functools.partial(_mask_pixel_loss_kernel,
                          rows=rows, tile_rows=tile_rows, inner_steps=inner_steps),
        out_shape=jax.ShapeDtypeStruct((NUM_PARTIALS * 8, LANES), jnp.float32),
        grid_spec=pltpu.PrefetchScalarGridSpec(
            num_scalar_prefetch=0,
            grid=(NUM_PARTIALS, inner_steps),
            in_specs=[tile_spec, tile_spec, tile_spec],
            out_specs=pl.BlockSpec((8, LANES), lambda p, i: (p, 0)),
            scratch_shapes=[pltpu.VMEM((8, LANES), jnp.float32)],
        ),
        compiler_params=pltpu.CompilerParams(
            dimension_semantics=("parallel", "arbitrary"),
        ),
    )(m, a, b)

    # Single cross-lane/cross-partial reduction + sqrt in the wrapper (partials
    # from both TensorCores must be combined before the sqrt anyway).
    return jnp.sqrt(jnp.sum(partials)) / weight


def _reference(mask_image, image1, image2):
    weight = image1.shape[2] * image2.shape[3]
    prod = mask_image.astype(jnp.float32) * (
        image1.astype(jnp.float32) - image2.astype(jnp.float32)
    )
    return jnp.sqrt(jnp.sum(prod * prod)) / weight


if __name__ == "__main__":
    key = jax.random.PRNGKey(0)
    k1, k2, k3 = jax.random.split(key, 3)

    # NCHW inputs, small shapes
    N, C, H, W = 2, 4, 16, 16
    mask_image = (jax.random.uniform(k1, (N, C, H, W)) > 0.5).astype(jnp.float32)
    image1 = jax.random.normal(k2, (N, C, H, W), dtype=jnp.float32)
    image2 = jax.random.normal(k3, (N, C, H, W), dtype=jnp.float32)

    loss = mask_pixel_loss(mask_image, image1, image2)
    jax.block_until_ready(loss)

    ref = _reference(mask_image, image1, image2)
    assert jnp.allclose(loss, ref, rtol=1e-5, atol=1e-6), (loss, ref)

    print("KERNEL_OK")
</pallas_src>

<mosaic_0001>
module attributes {stable_mosaic.version = 11 : i64} {
  func.func @_mask_pixel_loss_kernel(%arg0: i32, %arg1: i32, %arg2: memref<16x128xf32, #tpu.memory_space<vmem>>, %arg3: memref<16x128xf32, #tpu.memory_space<vmem>>, %arg4: memref<16x128xf32, #tpu.memory_space<vmem>>, %arg5: memref<8x128xf32, #tpu.memory_space<vmem>>, %arg6: memref<8x128xf32, #tpu.memory_space<vmem>>) attributes {dimension_semantics = [#tpu.dimension_semantics<parallel>, #tpu.dimension_semantics<arbitrary>], iteration_bounds = array<i64: 2, 1>, scalar_prefetch = 0 : i64, scratch_operands = 1 : i64, tpu.core_type = #tpu.core_type<tc>, window_params = [{transform_indices = @transform_0, window_bounds = array<i64: 16, 128>}, {transform_indices = @transform_1, window_bounds = array<i64: 16, 128>}, {transform_indices = @transform_2, window_bounds = array<i64: 16, 128>}, {transform_indices = @transform_3, window_bounds = array<i64: 8, 128>}]} {
    %c0_i32 = arith.constant 0 : i32
    %0 = arith.cmpi eq, %arg1, %c0_i32 : i32
    %1 = arith.extui %0 : i1 to i32
    %c0_i32_0 = arith.constant 0 : i32
    %2 = arith.cmpi ne, %1, %c0_i32_0 : i32
    scf.if %2 {
      %cst_14 = arith.constant 0.000000e+00 : f32
      %26 = vector.broadcast %cst_14 : f32 to vector<8x128xf32>
      %c0_15 = arith.constant 0 : index
      %c0_16 = arith.constant 0 : index
      %27 = vector.load %arg6[%c0_15, %c0_16] : memref<8x128xf32, #tpu.memory_space<vmem>>, vector<8x128xf32>
      tpu.vector_store %arg6[%c0_15, %c0_16], %26 {strides = array<i32>} : memref<8x128xf32, #tpu.memory_space<vmem>>, vector<8x128xf32>,
    } else {
    }
    %c1_i32 = arith.constant 1 : i32
    %3 = arith.muli %arg0, %c1_i32 : i32
    %4 = arith.addi %3, %arg1 : i32
    %c16_i32 = arith.constant 16 : i32
    %5 = arith.muli %4, %c16_i32 : i32
    %c16_i32_1 = arith.constant 16 : i32
    %6 = arith.subi %c16_i32_1, %5 : i32
    %7 = tpu.iota {dimensions = array<i32: 0>} : vector<16x128xi32>
    %8 = vector.broadcast %6 : i32 to vector<16x128xi32>
    %9 = arith.cmpi slt, %7, %8 : vector<16x128xi32>
    %c0 = arith.constant 0 : index
    %c0_2 = arith.constant 0 : index
    %10 = vector.load %arg3[%c0, %c0_2] : memref<16x128xf32, #tpu.memory_space<vmem>>, vector<16x128xf32>
    %c0_3 = arith.constant 0 : index
    %c0_4 = arith.constant 0 : index
    %11 = vector.load %arg4[%c0_3, %c0_4] : memref<16x128xf32, #tpu.memory_space<vmem>>, vector<16x128xf32>
    %12 = arith.subf %10, %11 : vector<16x128xf32>
    %c0_5 = arith.constant 0 : index
    %c0_6 = arith.constant 0 : index
    %13 = vector.load %arg2[%c0_5, %c0_6] : memref<16x128xf32, #tpu.memory_space<vmem>>, vector<16x128xf32>
    %14 = arith.mulf %12, %13 : vector<16x128xf32>
    %15 = arith.mulf %14, %14 : vector<16x128xf32>
    %cst = arith.constant 0.000000e+00 : f32
    %16 = vector.broadcast %cst : f32 to vector<16x128xf32>
    %17 = arith.select %9, %15, %16 : vector<16x128xi1>, vector<16x128xf32>
    %c0_7 = arith.constant 0 : index
    %c0_8 = arith.constant 0 : index
    %18 = vector.load %arg6[%c0_7, %c0_8] : memref<8x128xf32, #tpu.memory_space<vmem>>, vector<8x128xf32>
    %19 = vector.shape_cast %17 : vector<16x128xf32> to vector<2x8x128xf32>
    %cst_9 = arith.constant dense<0.000000e+00> : vector<8x128xf32>
    %20 = vector.multi_reduction <add>, %19, %cst_9 [0] : vector<2x8x128xf32> to vector<8x128xf32>
    %21 = arith.addf %18, %20 : vector<8x128xf32>
    %c0_10 = arith.constant 0 : index
    %c0_11 = arith.constant 0 : index
    %22 = vector.load %arg6[%c0_10, %c0_11] : memref<8x128xf32, #tpu.memory_space<vmem>>, vector<8x128xf32>
    tpu.vector_store %arg6[%c0_10, %c0_11], %21 {strides = array<i32>} : memref<8x128xf32, #tpu.memory_space<vmem>>, vector<8x128xf32>,
    %c0_i32_12 = arith.constant 0 : i32
    %23 = arith.cmpi eq, %arg1, %c0_i32_12 : i32
    %24 = arith.extui %23 : i1 to i32
    %c0_i32_13 = arith.constant 0 : i32
    %25 = arith.cmpi ne, %24, %c0_i32_13 : i32
    scf.if %25 {
      %c0_14 = arith.constant 0 : index
      %c0_15 = arith.constant 0 : index
      %26 = vector.load %arg6[%c0_14, %c0_15] : memref<8x128xf32, #tpu.memory_space<vmem>>, vector<8x128xf32>
      %c0_16 = arith.constant 0 : index
      %c0_17 = arith.constant 0 : index
      %27 = vector.load %arg5[%c0_16, %c0_17] : memref<8x128xf32, #tpu.memory_space<vmem>>, vector<8x128xf32>
      tpu.vector_store %arg5[%c0_16, %c0_17], %26 {strides = array<i32>} : memref<8x128xf32, #tpu.memory_space<vmem>>, vector<8x128xf32>,
    } else {
    }
    return
  }
  func.func @transform_0(%arg0: i32, %arg1: i32) -> (i32, i32) {
    %c1_i32 = arith.constant 1 : i32
    %0 = arith.muli %arg0, %c1_i32 : i32
    %1 = arith.addi %0, %arg1 : i32
    %c0_i32 = arith.constant 0 : i32
    %2 = arith.minsi %1, %c0_i32 : i32
    %c0_i32_0 = arith.constant 0 : i32
    %c0_i32_1 = arith.constant 0 : i32
    return %2, %c0_i32_0 : i32, i32
  }
  func.func @transform_1(%arg0: i32, %arg1: i32) -> (i32, i32) {
    %c1_i32 = arith.constant 1 : i32
    %0 = arith.muli %arg0, %c1_i32 : i32
    %1 = arith.addi %0, %arg1 : i32
    %c0_i32 = arith.constant 0 : i32
    %2 = arith.minsi %1, %c0_i32 : i32
    %c0_i32_0 = arith.constant 0 : i32
    %c0_i32_1 = arith.constant 0 : i32
    return %2, %c0_i32_0 : i32, i32
  }
  func.func @transform_2(%arg0: i32, %arg1: i32) -> (i32, i32) {
    %c1_i32 = arith.constant 1 : i32
    %0 = arith.muli %arg0, %c1_i32 : i32
    %1 = arith.addi %0, %arg1 : i32
    %c0_i32 = arith.constant 0 : i32
    %2 = arith.minsi %1, %c0_i32 : i32
    %c0_i32_0 = arith.constant 0 : i32
    %c0_i32_1 = arith.constant 0 : i32
    return %2, %c0_i32_0 : i32, i32
  }
  func.func @transform_3(%arg0: i32, %arg1: i32) -> (i32, i32) {
    %c0_i32 = arith.constant 0 : i32
    %c0_i32_0 = arith.constant 0 : i32
    return %arg0, %c0_i32 : i32, i32
  }
}

</mosaic_0001>

<bundles_post_ra>
// kernel: tpu_custom_call.1
= control target key start
LH: loop header
LB: loop body
LE: loop exit
PB: predicated region body
PF: predicated region fallthrough
CT: control target
= control target key end

     0   :  { %s1087_s0 = inlined_call_operand.hbm [shape: f32[16,128], index: 0, kind: input, shape index: {}]   ;;  %s1088_s1 = inlined_call_operand.hbm [shape: f32[16,128], index: 1, kind: input, shape index: {}]   ;;  %s1089_s2 = inlined_call_operand.hbm [shape: f32[16,128], index: 2, kind: input, shape index: {}]   ;;  %s1090_s3 = inlined_call_operand.hbm [shape: f32[16,128], index: 3, kind: output, shape index: {}]  }
   0x1   :  { %1097 = sst [smem:[#allocation16_spill]] %s1088_s1 }
   0x2   :  { %8 = vsyncpa [#allocation4], 0 }
   0x3   :  { %10 = vsyncpa [#allocation4 + $0x1], 0 }
   0x4   :  { %11 = vsyncpa [#allocation7], 0 }
   0x5   :  { %13 = vsyncpa [#allocation7 + $0x1], 0 }
   0x6   :  { %14 = vsyncpa [#allocation5], 0 }
   0x7   :  { %16 = vsyncpa [#allocation5 + $0x1], 0  ;;  %s838_s12 = smov 0   ;;  %s840_s13 = smov 0  }
   0x8   :  { %s842_s14 = smov 0   ;;  %s844_s15 = smov 0  }
   0x9   :  { %s846_s16 = smov 0   ;;  %s848_s17 = smov 0  }
   0xa   :  { %s850_s18 = smov 0   ;;  %s852_s19 = smov 0  }
   0xb LB: > { %1098 = sst [smem:[#allocation13_spill]] %s806_s18  ;;  %s877_s20 = sadd.s32 4294967295, %s810_s19   ;;  %s810_s19 = sphi %s852_s19, %s22_s19   ;;  %s806_s18 = sphi %s850_s18, %s1119_s18   ;;  %s802_s17 = sphi %s848_s17, %s1118_s17   ;;  %s798_s16 = sphi %s846_s16, %s1077_s16   ;;  %s794_s15 = sphi %s844_s15, %s1123_s15   ;;  %s790_s14 = sphi %s842_s14, %s1122_s14   ;;  %s786_s13 = sphi %s840_s13, %s1121_s13   ;;  %s782_s12 = sphi %s838_s12, %s1120_s12  }
   0xc   : > { %s490_s21 = sadd.s32 4294967294, %s810_s19   ;;  %s34_s22 = sadd.s32 1, %s806_s18 }
   0xd   : > { %p36_p0 = scmp.ge.s32.totalorder %s34_s22, 2  ;;  %p779_p1 = scmp.ne.s32.totalorder %s798_s16, 0 }
   0xe   : > { %p55_p2 = scmp.eq.s32.totalorder %s810_s19, 0  ;;  %p60_p3 = scmp.ne.s32.totalorder %s798_s16, %s794_s15 }
   0xf   : > { %s1125_s22 = smov (%p36_p0, %s34_s22), 0  ;;  %p61_p5 = scmp.eq.s32.totalorder %s877_s20, 0 }
  0x10   : > { %1099 = sst [smem:[#allocation14_spill]] %s1125_s22  ;;  %p886_p4 = por %p779_p1, %p55_p2 }
  0x11   : > { %p891_p6 = por %p61_p5, %p60_p3  ;;  %s134_s25 = ssub.s32 %s806_s18, %s1125_s22 }
  0x12   : > { %p135_p7 = scmp.eq.s32.totalorder %s134_s25, 0  ;;  %s137_s26 = sadd.s32 1, %s790_s14 }
  0x13   : > { %s1101_s24 = scalar_select %p891_p6, 1, 0 }
  0x14   : > { %s899_s27 = scalar_select %p135_p7, %s790_s14, %s137_s26  }
  0x15   : > { %p147_p8 = scmp.ne.s32.totalorder %s790_s14, %s786_s13  ;;  %p148_p9 = scmp.eq.s32.totalorder %s877_s20, 1 }
  0x16   : > { %1102 = sst [smem:[#allocation15_spill]] %s899_s27  ;;  %p153_p10 = scmp.ne.s32.totalorder %s786_s13, %s782_s12 }
  0x17   : > { %p154_p11 = scmp.eq.s32.totalorder %s490_s21, 1  ;;  %p906_p12 = por %p148_p9, %p147_p8 }
  0x18   : > { %p537_p1 = scmp.lt.s32.totalorder %s810_s19, 2  ;;  %s198_s4 = sand.u32 1, %s810_s19  }
  0x19   : > { %s1103_s28 = scalar_select %p906_p12, 1, 0 }
  0x1a   : > { %p911_p0 = por %p154_p11, %p153_p10  ;;  %p918_p2 = pnand %p537_p1, %p886_p4 }
  0x1b   : > { %s812_s5 = smov [#allocation6]   ;;  %s926_s7 = scalar_lea.sflag [#allocation7], %s198_s4 }
  0x1c   : > { %s1104_s29 = scalar_select %p911_p0, 1, 0 }
  0x1d   : > { %s1105_s30 = scalar_select %p918_p2, 1, 0 }
  0x1e   : > { %s212_s6 = sshll.u32 %s812_s5, 4  ;;  %s1106_s1 = sld [smem:[#allocation16_spill]]  ;;  %s923_s6 = int_to_ptr.vmem [resolvable:$true] %s212_s6 }
  0x1f   : > { %p936_p5 = pneg %p918_p2 }
  0x24   : > { %s613_s10 = scalar_lea.hbm %s1106_s1, 256 }
  0x25   : > { %p614_p4 = scmp.ne.s32.totalorder %s1106_s1, %s613_s10  ;;  %p620_p9 = scmp.lt.u32.totalorder %s613_s10, %s613_s10 }
  0x26   : > { %p622_p10 = scmp.lt.u32.totalorder %s613_s10, %s1106_s1 }
  0x27   : > { %p616_p7 = pnand %p936_p5, %p614_p4 }
  0x28   : > { %p623_p11 = por %p622_p10, %p620_p9 }
  0x29   : > { %p617_p8 = pneg %p616_p7 }
  0x2b   : > { %p624_p1 = pnand %p623_p11, %p617_p8 }
  0x2d   : > { %627 = shalt.err (!%p624_p1)
}
  0x2e   : > { %s628_s26 = scalar_lea.vmem %s923_s6, 256  ;;  %s635_s4 = scalar_lea.vmem %s923_s6, 512 }
  0x2f   : > { %p629_p13 = scmp.ne.s32.totalorder %s923_s6, %s628_s26  ;;  %p636_p4 = scmp.lt.s32.totalorder %s923_s6, %s923_s6 }
  0x30   : > { %p637_p7 = scmp.lt.s32.totalorder %s635_s4, %s628_s26 }
  0x31   : > { %p631_p3 = pnand %p629_p13, %p936_p5 }
  0x32   : > { %p638_p12 = por %p637_p7, %p636_p4 }
  0x33   : > { %p632_p0 = pneg %p631_p3 }
  0x35   : > { %p639_p6 = pnand %p638_p12, %p632_p0 }
  0x37   : > { %642 = shalt.err (!%p639_p6)
}
  0x38   : > { %s813_s5 = smov 128   ;;  %s814_s8 = smov 8  }
  0x39   : > { %529 = dma.hbm_to_vmem [thread:$0]  (!%p918_p2), %s1106_s1, 256, %s923_s6, %s926_s7, %s813_s5, %s813_s5, %s814_s8  }
  0x3a   : > { %p244_p13 = scmp.lt.s32.totalorder %s810_s19, 3  ;;  %p1108_p3 = scmp.ge.s32.totalorder %s810_s19, 1 }
  0x3b   : > { %s815_s15 = smov [#allocation3]   ;;  %s643_s4 = scalar_lea.hbm %s1087_s0, 256 }
  0x3c   : > { %p965_p12 = pnand %p1108_p3, %p244_p13  ;;  %s188_s23 = sshll.u32 %s815_s15, 4  ;;  %s189_s23 = int_to_ptr.vmem [resolvable:$true] %s188_s23 }
  0x3d   : > { %p644_p6 = scmp.ne.s32.totalorder %s1087_s0, %s643_s4  ;;  %p650_p9 = scmp.lt.u32.totalorder %s643_s4, %s643_s4 }
  0x3e   : > { %s1109_s11 = scalar_select %p965_p12, 1, 0 }
  0x3f   : > { %p646_p0 = pnand %p644_p6, %p936_p5  ;;  %p652_p10 = scmp.lt.u32.totalorder %s643_s4, %s1087_s0 }
  0x41   : > { %p647_p8 = pneg %p646_p0  ;;  %p653_p11 = por %p652_p10, %p650_p9 }
  0x43   : > { %p654_p1 = pnand %p653_p11, %p647_p8 }
  0x45   : > { %657 = shalt.err (!%p654_p1)
}
  0x46   : > { %s658_s10 = scalar_lea.vmem %s189_s23, 256  ;;  %s665_s15 = scalar_lea.vmem %s189_s23, 512 }
  0x47   : > { %p659_p4 = scmp.ne.s32.totalorder %s189_s23, %s658_s10  ;;  %p666_p3 = scmp.lt.s32.totalorder %s189_s23, %s189_s23 }
  0x48   : > { %p667_p12 = scmp.lt.s32.totalorder %s665_s15, %s658_s10 }
  0x49   : > { %p661_p7 = pnand %p659_p4, %p936_p5 }
  0x4a   : > { %p668_p2 = por %p667_p12, %p666_p3 }
  0x4b   : > { %p662_p13 = pneg %p661_p7 }
  0x4d   : > { %p669_p6 = pnand %p668_p2, %p662_p13 }
  0x4f   : > { %672 = shalt.err (!%p669_p6)
}
  0x50   : > { %p1110_p0 = scmp.ne.s32.totalorder %s1105_s30, 0  ;;  %s816_s25 = smov [#allocation8]  }
  0x51   : > { %s236_s26 = sshll.u32 %s816_s25, 4  ;;  %s673_s9 = scalar_lea.hbm %s1089_s2, 256  ;;  %s237_s26 = int_to_ptr.vmem [resolvable:$true] %s236_s26 }
  0x52   : > { %526 = dma.hbm_to_vmem [thread:$0]  (!%p1110_p0), %s1087_s0, 256, %s189_s23, [#allocation4], %s813_s5, %s813_s5, %s814_s8  }
  0x53   : > { %p674_p2 = scmp.ne.s32.totalorder %s1089_s2, %s673_s9  ;;  %p680_p9 = scmp.lt.u32.totalorder %s673_s9, %s673_s9 }
  0x54   : > { %p682_p10 = scmp.lt.u32.totalorder %s673_s9, %s1089_s2 }
  0x55   : > { %p676_p12 = pnand %p674_p2, %p936_p5 }
  0x56   : > { %p683_p11 = por %p682_p10, %p680_p9 }
  0x57   : > { %p677_p8 = pneg %p676_p12 }
  0x59   : > { %p684_p1 = pnand %p683_p11, %p677_p8 }
  0x5b   : > { %687 = shalt.err (!%p684_p1)
}
  0x5c   : > { %s688_s23 = scalar_lea.vmem %s237_s26, 256  ;;  %s695_s18 = scalar_lea.vmem %s237_s26, 512 }
  0x5d   : > { %p689_p4 = scmp.ne.s32.totalorder %s237_s26, %s688_s23  ;;  %p696_p3 = scmp.lt.s32.totalorder %s237_s26, %s237_s26 }
  0x5e   : > { %p697_p6 = scmp.lt.s32.totalorder %s695_s18, %s688_s23 }
  0x5f   : > { %p691_p7 = pnand %p689_p4, %p936_p5 }
  0x60   : > { %p698_p0 = por %p697_p6, %p696_p3 }
  0x61   : > { %p692_p13 = pneg %p691_p7 }
  0x63   : > { %p699_p2 = pnand %p698_p0, %p692_p13 }
  0x65   : > { %702 = shalt.err (!%p699_p2)
}
  0x66   : > { %p1111_p12 = scmp.ne.s32.totalorder %s1105_s30, 0  ;;  %p1112_p8 = scmp.ne.s32.totalorder %s1109_s11, 0 }
  0x67   : > { %s250_s21 = sand.u32 (!%p1112_p8), 1, %s798_s16   ;;  %p1113_p5 = scmp.ne.s32.totalorder (!%p1112_p8), %s1101_s24, 0 }
  0x68   : > { %532 = dma.hbm_to_vmem [thread:$0]  (!%p1111_p12), %s1089_s2, 256, %s237_s26, %s926_s7, %s813_s5, %s813_s5, %s814_s8  }
  0x69   : > { %248 = sbr.rel (%p1112_p8) target bundleno = 144 (0x90), region = 32  ;;  %s503_s22 = sshll.u32 (!%p1112_p8), %s250_s21, 4 }
  0x6a   : > { %s251_s25 = scalar_lea.sflag (!%p1112_p8), [#allocation4], %s250_s21  ;;  %s254_s4 = scalar_lea.vmem (!%p1112_p8), [#allocation3], %s503_s22 }
  0x70   : > { %768 = dma.done.wait (%p1113_p5), %s251_s25, 256  }
  0x71   : > { %770 = vsyncadd (%p1113_p5), %s251_s25, 4294967040  ;;  %s259_s30 = sand.u32 1, %s877_s20   ;;  %s263_s9 = scalar_lea.vmem [#allocation6], %s503_s22 }
  0x72   : > { %s260_s6 = scalar_lea.sflag [#allocation7], %s259_s30 }
  0x73   : > { %772 = dma.done.wait (%p1113_p5), %s260_s6, 512  }
  0x74   : > { %774 = vsyncadd (%p1113_p5), %s260_s6, 4294966784  ;;  %v325_v0 = vlaneseq  ;;  %s507_s7 = sshll.u32 %s802_s17, 4  ;;  %s302_s5 = sand.u32 1, %s786_s13   ;;  %v331_v2 = vld [vmem:[%s263_s9] sm:$0xff]  ;;  %v332_v3 = vld [vmem:[%s263_s9 + $0x8] sm:$0xff] }
  0x75   : > { %s324_s8 = ssub.s32 16, %s507_s7  ;;  %s506_s11 = sshll.u32 %s302_s5, 3  ;;  %v337_v9 = vld [vmem:[%s254_s4] sm:$0xff]  ;;  %v338_v10 = vld [vmem:[%s254_s4 + $0x8] sm:$0xff] }
  0x76   : > { %v326_v1 = vshrl.u32 %v325_v0, 7  ;;  %s272_s20 = scalar_lea.vmem [#allocation8], %s503_s22  ;;  %v328_v6 = vstv %s324_s8  ;;  %s304_s24 = scalar_lea.vmem [#allocation9], %s506_s11 }
  0x77   : > { %v333_v4 = vld [vmem:[%s272_s20] sm:$0xff]  ;;  %v334_v7 = vld [vmem:[%s272_s20 + $0x8] sm:$0xff]  ;;  %s368_s26 = sshll.u32 %s304_s24, 4  ;;  %s509_s10 = sshll.u32 %s802_s17, 7  ;;  %s1029_s26 = int_to_ptr.vmem [resolvable:$true] %s368_s26 }
  0x78   : > { %v327_v5 = vadd.s32 8, %v326_v1  ;;  %v335_v8 = vsub.f32 %v331_v2, %v333_v4  ;;  %v336_v11 = vsub.f32 %v332_v3, %v334_v7  ;;  %vm329_vm0 = vcmp.lt.s32.totalorder %v326_v1, %v328_v6  ;;  %s1034_s18 = scalar_lea.hbm %s1090_s3, %s509_s10  ;;  %s355_s1 = scalar_lea.sflag [#allocation5], %s302_s5 }
  0x79   : > { %s703_s27 = scalar_lea.vmem %s1029_s26, 128  ;;  %p1114_p9 = scmp.ne.s32.totalorder %s1103_s28, 0 }
  0x7a   : > { %v339_v12 = vmul.f32 %v337_v9, %v335_v8  ;;  %v340_v13 = vmul.f32 %v338_v10, %v336_v11  ;;  %vm330_vm1 = vcmp.lt.s32.totalorder %v327_v5, %v328_v6  ;;  %p704_p0 = scmp.ne.s32.totalorder %s1029_s26, %s703_s27  ;;  %s817_s17 = smov [#allocation9]  }
  0x7b   : > { %s707_s21 = sshll.u32 %s817_s17, 4  ;;  %s708_s21 = int_to_ptr.vmem [resolvable:$false] %s707_s21 }
  0x7c   : > { %v341_v14 = vmul.f32 %v339_v12, %v339_v12  ;;  %v342_v15 = vmul.f32 %v340_v13, %v340_v13  ;;  %p705_p10 = pnand %p704_p0, %p1114_p9  ;;  %s709_s22 = scalar_lea.vmem %s708_s21, 256 }
  0x7d   : > { %p710_p1 = scmp.lt.s32.totalorder %s1029_s26, %s708_s21  ;;  %p711_p4 = scmp.lt.s32.totalorder %s709_s22, %s703_s27 }
  0x7e   : > { %v343_v16 = vsel %vm329_vm0, %v341_v14, 0.0  ;;  %v344_v17 = vsel %vm330_vm1, %v342_v15, 0.0  ;;  %p706_p11 = pneg %p705_p10 }
  0x7f   : > { %v346_v18 = vadd.f32 %v344_v17, %v343_v16  ;;  %p712_p7 = por %p711_p4, %p710_p1 }
  0x81   : > { %353 = vst [vmem:[%s304_s24] sm:$0xff] %v346_v18  ;;  %p713_p13 = pnand %p712_p7, %p706_p11 }
  0x83   : > { %716 = shalt.err (!%p713_p13)
}
  0x84   : > { %s717_s25 = scalar_lea.hbm %s1034_s18, 128  ;;  %s721_s6 = scalar_lea.hbm %s1090_s3, 256 }
  0x85   : > { %p718_p3 = scmp.ne.s32.totalorder %s1034_s18, %s717_s25  ;;  %p722_p12 = scmp.lt.u32.totalorder %s1034_s18, %s1090_s3 }
  0x86   : > { %p723_p8 = scmp.lt.u32.totalorder %s721_s6, %s717_s25  ;;  %p725_p0 = scmp.lt.u32.totalorder %s717_s25, %s1034_s18 }
  0x87   : > { %p719_p6 = pnand %p718_p3, %p1114_p9 }
  0x88   : > { %p724_p5 = por %p723_p8, %p722_p12 }
  0x89   : > { %p720_p2 = pneg %p719_p6 }
  0x8a   : > { %p726_p10 = por %p725_p0, %p724_p5 }
  0x8c   : > { %p727_p11 = pnand %p726_p10, %p720_p2 }
  0x8e   : > { %730 = shalt.err (!%p727_p11)
}
  0x8f   : > { %521 = dma.vmem_to_hbm [thread:$0]  (%p1114_p9), %s1029_s26, 128, %s1034_s18, %s355_s1  }
  0x90 PF: > { %s380_s5 = sand.u32 1, %s782_s12   ;;  %p1115_p1 = scmp.ne.s32.totalorder %s1104_s29, 0 }
  0x91   : > { %p1116_p4 = scmp.ge.s32.totalorder %s810_s19, 2  ;;  %s381_s8 = scalar_lea.sflag [#allocation5], %s380_s5 }
  0x93   : > { %p534_p7 = pnand %p1116_p4, %p1115_p1 }
  0x95   : > { %776 = dma.done.wait (!%p534_p7), %s381_s8, 128  }
  0x96   : > { %778 = vsyncadd (!%p534_p7), %s381_s8, 4294967168  ;;  %s22_s19 = sadd.s32 1, %s810_s19   ;;  %s1117_s28 = sld [smem:[#allocation15_spill]] }
  0x97   : > { %p19_p13 = scmp.ge.s32.totalorder %s22_s19, 4   ;;  %s1118_s17 = sld [smem:[#allocation13_spill]] }
  0x98   : > { %s1119_s18 = sld [smem:[#allocation14_spill]]  ;;  %s1120_s12 = smov %s786_s13 }
  0x99   : > { %s1121_s13 = smov %s790_s14  ;;  %s1123_s15 = smov %s798_s16 }
  0x9a   : > { %s1077_s16 = smov 0   ;;  %21 = sbr.rel (!%p19_p13) target bundleno = 11 (0xb), region = 109 }
  0x9c   : > { %s1122_s14 = smov %s1117_s28 }
  0xa1   :  { %386 = vsyncpa [#allocation4], 1 }
  0xa2   :  { %388 = vsyncpa [#allocation4 + $0x1], 1 }
  0xa3   :  { %389 = vsyncpa [#allocation7], 1 }
  0xa4   :  { %391 = vsyncpa [#allocation7 + $0x1], 1 }
  0xa5   :  { %392 = vsyncpa [#allocation5], 1 }
  0xa6   :  { %394 = vsyncpa [#allocation5 + $0x1], 1 }

</bundles_post_ra>
